<compile_context>
chip_gen: v5e
topology: v5e:2x2
jax: 0.10.0
libtpu: 0.0.40
codegen_flags: <defaults>
</compile_context>

<pallas_src>
import math

import jax
import jax.numpy as jnp
from jax.experimental import pallas as pl
from jax.experimental.pallas import tpu as pltpu

LANE = 128
NEG_SLOPE = 0.01  # torch F.leaky_relu default


def _gat_kernel(h_ref, w_ref, a_ref, o_ref):
    # h_ref: (Bb, N, Fp)   w_ref: (Fp, Fp)   a_ref: (2, Fp)   o_ref: (Bb, N, Fp)
    Bb, N, Fp = h_ref.shape

    W = w_ref[...]                                   # (Fp, Fp), f32
    a1 = a_ref[0:1, :]                               # (1, Fp)  first half of a
    a2 = a_ref[1:2, :]                               # (1, Fp)  second half of a

    # One lane-dense MXU matmul for all batch elements at once.
    h2 = h_ref[...].reshape(Bb * N, Fp)                                   # (Bb*N, Fp)
    Wh = jnp.dot(h2, W, preferred_element_type=jnp.float32)               # (Bb*N, Fp)

    # Rank-1 score projections on VPU/XLU (padded lanes are zero -> contribute 0).
    f1 = jnp.sum(Wh * a1, axis=-1, keepdims=True)                         # (Bb*N, 1)
    f2 = jnp.sum(Wh * a2, axis=-1, keepdims=True)                         # (Bb*N, 1)

    # Static unroll over the (small) batch elements packed in this block.
    for b in range(Bb):
        lo, hi = b * N, (b + 1) * N                    # static slices: zero cost
        e = f1[lo:hi, :] + f2[lo:hi, :].T                                 # (N, N)
        e = jnp.where(e > 0, e, NEG_SLOPE * e)                            # leaky_relu
        e = e - jnp.max(e, axis=-1, keepdims=True)
        p = jnp.exp(e)                                                    # EUP
        s = jnp.sum(p, axis=-1, keepdims=True)
        r = pl.reciprocal(s, approx=True)              # EUP slot (otherwise idle)
        r = r * (2.0 - s * r)                          # one Newton step -> ~f32 exact
        attn = p * r                                                      # (N, N)
        out = jnp.dot(attn, Wh[lo:hi, :], preferred_element_type=jnp.float32)
        o_ref[b] = out.astype(o_ref.dtype)


def gat_forward(h, adj, W, a, *, batch_block=None):
    # `adj` is accepted for signature parity with the PyTorch module but unused:
    # the reference forward never masks attention with it.
    del adj
    B, N, F_dim = h.shape
    assert W.shape == (F_dim, F_dim)
    assert a.shape == (2 * F_dim, 1)

    # Pad feature axis to a lane-dense multiple of 128 (zero pad; sliced off below).
    Fp = ((F_dim + LANE - 1) // LANE) * LANE
    h_p = jnp.pad(h, ((0, 0), (0, 0), (0, Fp - F_dim)))
    W_p = jnp.pad(W, ((0, Fp - F_dim), (0, Fp - F_dim)))
    # Pack a = [a1; a2] as two lane-dense rows (row 0 = a1, row 1 = a2).
    a_rows = jnp.pad(a[:, 0].reshape(2, F_dim), ((0, 0), (0, Fp - F_dim)))

    # Fold the whole (small) batch into a single grid step when possible.
    if batch_block is None:
        batch_block = B if B <= 8 else 8
        while B % batch_block != 0:
            batch_block -= 1
    assert B % batch_block == 0, "batch must be divisible by batch_block"
    grid = (B // batch_block,)

    out_p = pl.pallas_call(
        _gat_kernel,
        out_shape=jax.ShapeDtypeStruct((B, N, Fp), h.dtype),
        grid=grid,
        in_specs=[
            pl.BlockSpec((batch_block, N, Fp), lambda i: (i, 0, 0)),
            pl.BlockSpec((Fp, Fp), lambda i: (0, 0)),
            pl.BlockSpec((2, Fp), lambda i: (0, 0)),
        ],
        out_specs=pl.BlockSpec((batch_block, N, Fp), lambda i: (i, 0, 0)),
        compiler_params=pltpu.CompilerParams(
            dimension_semantics=("parallel",)),
    )(h_p, W_p, a_rows)

    return out_p[:, :, :F_dim]


def reference_forward(h, adj, W, a):
    # Pure-JAX mirror of the PyTorch forward (for validation).
    del adj
    Wh = jnp.matmul(h, W)                                              # (B, N, F)
    N = Wh.shape[1]
    Wh_rep_1 = jnp.repeat(Wh[:, :, None, :], N, axis=2)                # (B, N, N, F)
    Wh_rep_2 = jnp.repeat(Wh[:, None, :, :], N, axis=1)                # (B, N, N, F)
    a_input = jnp.concatenate([Wh_rep_1, Wh_rep_2], axis=-1)           # (B, N, N, 2F)
    e = jnp.matmul(a_input, a)[..., 0]                                 # (B, N, N)
    e = jnp.where(e > 0, e, NEG_SLOPE * e)                             # leaky_relu
    e = e - jnp.max(e, axis=-1, keepdims=True)
    attn = jax.nn.softmax(e, axis=-1)
    return jnp.matmul(attn, Wh)


def xavier_uniform(key, shape):
    fan_out, fan_in = shape[0], shape[1]
    bound = math.sqrt(6.0 / (fan_in + fan_out))
    return jax.random.uniform(key, shape, jnp.float32, -bound, bound)


if __name__ == "__main__":
    B, N, F_dim = 2, 16, 32

    key = jax.random.PRNGKey(0)
    k_h, k_adj, k_w, k_a = jax.random.split(key, 4)

    h = jax.random.normal(k_h, (B, N, F_dim), dtype=jnp.float32)
    adj = (jax.random.uniform(k_adj, (B, N, N)) > 0.5).astype(jnp.float32)

    W = xavier_uniform(k_w, (F_dim, F_dim))
    a = xavier_uniform(k_a, (2 * F_dim, 1))

    out = jax.block_until_ready(gat_forward(h, adj, W, a))
    ref = reference_forward(h, adj, W, a)

    assert out.shape == (B, N, F_dim)
    assert jnp.allclose(out, ref, atol=1e-4, rtol=1e-4), "Pallas output mismatch vs reference"

    print("KERNEL_OK")
</pallas_src>

<mosaic_0001>
module attributes {stable_mosaic.version = 11 : i64} {
  func.func @_gat_kernel(%arg0: i32, %arg1: memref<2x16x128xf32, #tpu.memory_space<vmem>>, %arg2: memref<128x128xf32, #tpu.memory_space<vmem>>, %arg3: memref<2x128xf32, #tpu.memory_space<vmem>>, %arg4: memref<2x16x128xf32, #tpu.memory_space<vmem>>) attributes {dimension_semantics = [#tpu.dimension_semantics<parallel>], iteration_bounds = array<i64: 1>, scalar_prefetch = 0 : i64, scratch_operands = 0 : i64, tpu.core_type = #tpu.core_type<tc>, window_params = [{transform_indices = @transform_0, window_bounds = array<i64: 2, 16, 128>}, {pipeline_mode = #tpu.pipeline_mode<synchronous>, transform_indices = @transform_1, window_bounds = array<i64: 128, 128>}, {pipeline_mode = #tpu.pipeline_mode<synchronous>, transform_indices = @transform_2, window_bounds = array<i64: 2, 128>}, {transform_indices = @transform_3, window_bounds = array<i64: 2, 16, 128>}]} {
    %c0 = arith.constant 0 : index
    %c0_0 = arith.constant 0 : index
    %0 = vector.load %arg2[%c0, %c0_0] : memref<128x128xf32, #tpu.memory_space<vmem>>, vector<128x128xf32>
    %c0_1 = arith.constant 0 : index
    %c0_2 = arith.constant 0 : index
    %1 = vector.load %arg3[%c0_1, %c0_2] : memref<2x128xf32, #tpu.memory_space<vmem>>, vector<1x128xf32>
    %c1 = arith.constant 1 : index
    %c0_3 = arith.constant 0 : index
    %2 = vector.load %arg3[%c1, %c0_3] : memref<2x128xf32, #tpu.memory_space<vmem>>, vector<1x128xf32>
    %c0_4 = arith.constant 0 : index
    %c0_5 = arith.constant 0 : index
    %c0_6 = arith.constant 0 : index
    %3 = vector.load %arg1[%c0_4, %c0_5, %c0_6] : memref<2x16x128xf32, #tpu.memory_space<vmem>>, vector<2x16x128xf32>
    %4 = vector.shape_cast %3 : vector<2x16x128xf32> to vector<32x128xf32>
    %cst = arith.constant dense<0.000000e+00> : vector<32x128xf32>
    %5 = tpu.matmul %4, %0, %cst {dimension_numbers = #tpu.dot_dimension_numbers<[1], [0], [0], [1], [0, 0, 1, 1], [], []>} : vector<32x128xf32>, vector<128x128xf32>, vector<32x128xf32> -> vector<32x128xf32>
    %6 = vector.broadcast %1 : vector<1x128xf32> to vector<32x128xf32>
    %7 = arith.mulf %5, %6 : vector<32x128xf32>
    %cst_7 = arith.constant dense<0.000000e+00> : vector<32xf32>
    %8 = vector.multi_reduction <add>, %7, %cst_7 [1] : vector<32x128xf32> to vector<32xf32>
    %9 = vector.shape_cast %8 : vector<32xf32> to vector<32x1xf32>
    %10 = vector.broadcast %2 : vector<1x128xf32> to vector<32x128xf32>
    %11 = arith.mulf %5, %10 : vector<32x128xf32>
    %cst_8 = arith.constant dense<0.000000e+00> : vector<32xf32>
    %12 = vector.multi_reduction <add>, %11, %cst_8 [1] : vector<32x128xf32> to vector<32xf32>
    %13 = vector.shape_cast %12 : vector<32xf32> to vector<32x1xf32>
    %14 = vector.extract_strided_slice %9 {offsets = [0, 0], sizes = [16, 1], strides = [1, 1]} : vector<32x1xf32> to vector<16x1xf32>
    %15 = vector.extract_strided_slice %13 {offsets = [0, 0], sizes = [16, 1], strides = [1, 1]} : vector<32x1xf32> to vector<16x1xf32>
    %16 = tpu.transpose %15, [1, 0] : vector<16x1xf32> -> vector<1x16xf32>
    %17 = vector.broadcast %14 : vector<16x1xf32> to vector<16x16xf32>
    %18 = vector.broadcast %16 : vector<1x16xf32> to vector<16x16xf32>
    %19 = arith.addf %17, %18 : vector<16x16xf32>
    %cst_9 = arith.constant 0.000000e+00 : f32
    %20 = vector.broadcast %cst_9 : f32 to vector<16x16xf32>
    %21 = arith.cmpf ogt, %19, %20 : vector<16x16xf32>
    %cst_10 = arith.constant 0.00999999977 : f32
    %22 = vector.broadcast %cst_10 : f32 to vector<16x16xf32>
    %23 = arith.mulf %22, %19 : vector<16x16xf32>
    %24 = arith.select %21, %19, %23 : vector<16x16xi1>, vector<16x16xf32>
    %cst_11 = arith.constant dense<0xFF800000> : vector<16xf32>
    %25 = vector.multi_reduction <maximumf>, %24, %cst_11 [1] : vector<16x16xf32> to vector<16xf32>
    %26 = vector.shape_cast %25 : vector<16xf32> to vector<16x1xf32>
    %27 = vector.broadcast %26 : vector<16x1xf32> to vector<16x16xf32>
    %28 = arith.subf %24, %27 : vector<16x16xf32>
    %29 = math.exp %28 : vector<16x16xf32>
    %cst_12 = arith.constant dense<0.000000e+00> : vector<16xf32>
    %30 = vector.multi_reduction <add>, %29, %cst_12 [1] : vector<16x16xf32> to vector<16xf32>
    %31 = vector.shape_cast %30 : vector<16xf32> to vector<16x1xf32>
    %32 = tpu.reciprocal %31 {approx = true} : vector<16x1xf32> -> vector<16x1xf32>
    %33 = arith.mulf %31, %32 : vector<16x1xf32>
    %cst_13 = arith.constant 2.000000e+00 : f32
    %34 = vector.broadcast %cst_13 : f32 to vector<16x1xf32>
    %35 = arith.subf %34, %33 : vector<16x1xf32>
    %36 = arith.mulf %32, %35 : vector<16x1xf32>
    %37 = vector.broadcast %36 : vector<16x1xf32> to vector<16x16xf32>
    %38 = arith.mulf %29, %37 : vector<16x16xf32>
    %39 = vector.extract_strided_slice %5 {offsets = [0, 0], sizes = [16, 128], strides = [1, 1]} : vector<32x128xf32> to vector<16x128xf32>
    %cst_14 = arith.constant dense<0.000000e+00> : vector<16x128xf32>
    %40 = tpu.matmul %38, %39, %cst_14 {dimension_numbers = #tpu.dot_dimension_numbers<[1], [0], [0], [1], [0, 0, 1, 1], [], []>} : vector<16x16xf32>, vector<16x128xf32>, vector<16x128xf32> -> vector<16x128xf32>
    %c0_15 = arith.constant 0 : index
    %c0_16 = arith.constant 0 : index
    %c0_17 = arith.constant 0 : index
    %41 = vector.load %arg4[%c0_15, %c0_16, %c0_17] : memref<2x16x128xf32, #tpu.memory_space<vmem>>, vector<1x16x128xf32>
    %42 = vector.shape_cast %41 : vector<1x16x128xf32> to vector<16x128xf32>
    %43 = vector.shape_cast %40 : vector<16x128xf32> to vector<1x16x128xf32>
    tpu.vector_store %arg4[%c0_15, %c0_16, %c0_17], %43 {strides = array<i32>} : memref<2x16x128xf32, #tpu.memory_space<vmem>>, vector<1x16x128xf32>,
    %44 = vector.extract_strided_slice %9 {offsets = [16, 0], sizes = [16, 1], strides = [1, 1]} : vector<32x1xf32> to vector<16x1xf32>
    %45 = vector.extract_strided_slice %13 {offsets = [16, 0], sizes = [16, 1], strides = [1, 1]} : vector<32x1xf32> to vector<16x1xf32>
    %46 = tpu.transpose %45, [1, 0] : vector<16x1xf32> -> vector<1x16xf32>
    %47 = vector.broadcast %44 : vector<16x1xf32> to vector<16x16xf32>
    %48 = vector.broadcast %46 : vector<1x16xf32> to vector<16x16xf32>
    %49 = arith.addf %47, %48 : vector<16x16xf32>
    %cst_18 = arith.constant 0.000000e+00 : f32
    %50 = vector.broadcast %cst_18 : f32 to vector<16x16xf32>
    %51 = arith.cmpf ogt, %49, %50 : vector<16x16xf32>
    %cst_19 = arith.constant 0.00999999977 : f32
    %52 = vector.broadcast %cst_19 : f32 to vector<16x16xf32>
    %53 = arith.mulf %52, %49 : vector<16x16xf32>
    %54 = arith.select %51, %49, %53 : vector<16x16xi1>, vector<16x16xf32>
    %cst_20 = arith.constant dense<0xFF800000> : vector<16xf32>
    %55 = vector.multi_reduction <maximumf>, %54, %cst_20 [1] : vector<16x16xf32> to vector<16xf32>
    %56 = vector.shape_cast %55 : vector<16xf32> to vector<16x1xf32>
    %57 = vector.broadcast %56 : vector<16x1xf32> to vector<16x16xf32>
    %58 = arith.subf %54, %57 : vector<16x16xf32>
    %59 = math.exp %58 : vector<16x16xf32>
    %cst_21 = arith.constant dense<0.000000e+00> : vector<16xf32>
    %60 = vector.multi_reduction <add>, %59, %cst_21 [1] : vector<16x16xf32> to vector<16xf32>
    %61 = vector.shape_cast %60 : vector<16xf32> to vector<16x1xf32>
    %62 = tpu.reciprocal %61 {approx = true} : vector<16x1xf32> -> vector<16x1xf32>
    %63 = arith.mulf %61, %62 : vector<16x1xf32>
    %cst_22 = arith.constant 2.000000e+00 : f32
    %64 = vector.broadcast %cst_22 : f32 to vector<16x1xf32>
    %65 = arith.subf %64, %63 : vector<16x1xf32>
    %66 = arith.mulf %62, %65 : vector<16x1xf32>
    %67 = vector.broadcast %66 : vector<16x1xf32> to vector<16x16xf32>
    %68 = arith.mulf %59, %67 : vector<16x16xf32>
    %69 = vector.extract_strided_slice %5 {offsets = [16, 0], sizes = [16, 128], strides = [1, 1]} : vector<32x128xf32> to vector<16x128xf32>
    %cst_23 = arith.constant dense<0.000000e+00> : vector<16x128xf32>
    %70 = tpu.matmul %68, %69, %cst_23 {dimension_numbers = #tpu.dot_dimension_numbers<[1], [0], [0], [1], [0, 0, 1, 1], [], []>} : vector<16x16xf32>, vector<16x128xf32>, vector<16x128xf32> -> vector<16x128xf32>
    %c1_24 = arith.constant 1 : index
    %c0_25 = arith.constant 0 : index
    %c0_26 = arith.constant 0 : index
    %71 = vector.load %arg4[%c1_24, %c0_25, %c0_26] : memref<2x16x128xf32, #tpu.memory_space<vmem>>, vector<1x16x128xf32>
    %72 = vector.shape_cast %71 : vector<1x16x128xf32> to vector<16x128xf32>
    %73 = vector.shape_cast %70 : vector<16x128xf32> to vector<1x16x128xf32>
    tpu.vector_store %arg4[%c1_24, %c0_25, %c0_26], %73 {strides = array<i32>} : memref<2x16x128xf32, #tpu.memory_space<vmem>>, vector<1x16x128xf32>,
    return
  }
  func.func @transform_0(%arg0: i32) -> (i32, i32, i32) {
    %c0_i32 = arith.constant 0 : i32
    %c0_i32_0 = arith.constant 0 : i32
    %c0_i32_1 = arith.constant 0 : i32
    return %arg0, %c0_i32, %c0_i32_0 : i32, i32, i32
  }
  func.func @transform_1(%arg0: i32) -> (i32, i32) {
    %c0_i32 = arith.constant 0 : i32
    %c0_i32_0 = arith.constant 0 : i32
    %c0_i32_1 = arith.constant 0 : i32
    return %c0_i32, %c0_i32_0 : i32, i32
  }
  func.func @transform_2(%arg0: i32) -> (i32, i32) {
    %c0_i32 = arith.constant 0 : i32
    %c0_i32_0 = arith.constant 0 : i32
    %c0_i32_1 = arith.constant 0 : i32
    return %c0_i32, %c0_i32_0 : i32, i32
  }
  func.func @transform_3(%arg0: i32) -> (i32, i32, i32) {
    %c0_i32 = arith.constant 0 : i32
    %c0_i32_0 = arith.constant 0 : i32
    %c0_i32_1 = arith.constant 0 : i32
    return %arg0, %c0_i32, %c0_i32_0 : i32, i32, i32
  }
}

</mosaic_0001>

<bundles_post_ra>
// kernel: tpu_custom_call.1
= control target key start
LH: loop header
LB: loop body
LE: loop exit
PB: predicated region body
PF: predicated region fallthrough
CT: control target
= control target key end

     0   :  { %8 = vsyncpa [#allocation3], 0  ;;  %s565_s0 = inlined_call_operand.hbm [shape: f32[2,16,128], index: 0, kind: input, shape index: {}]   ;;  %s566_s1 = inlined_call_operand.hbm [shape: f32[128,128], index: 1, kind: input, shape index: {}]   ;;  %s567_s2 = inlined_call_operand.hbm [shape: f32[2,128], index: 2, kind: input, shape index: {}]   ;;  %s568_s3 = inlined_call_operand.hbm [shape: f32[2,16,128], index: 3, kind: output, shape index: {}]  }
   0x1   :  { %9 = vsyncpa [#allocation6], 0 }
   0x2   :  { %10 = vsyncpa [#allocation4], 0  ;;  %s28_s14 = sshll.u32 %s566_s1, 4  ;;  %s506_s15 = smov [#allocation5]   ;;  %s29_s14 = int_to_ptr.hbm [resolvable:$true] %s28_s14 }
   0x3   :  { %s30_s16 = sshll.u32 %s506_s15, 4  ;;  %s15_s19 = sshll.u32 %s565_s0, 4  ;;  %s31_s16 = int_to_ptr.vmem [resolvable:$true] %s30_s16  ;;  %s16_s19 = int_to_ptr.hbm [resolvable:$true] %s15_s19 }
   0x4   :  { %s507_s20 = smov 128   ;;  %s508_s21 = smov 8  }
   0x5   :  { %36 = dma.hbm_to_vmem [thread:$0]  %s29_s14, 2048, %s31_s16, [#allocation6], %s507_s20, %s507_s20, %s508_s21  }
   0x6   :  { %s509_s22 = smov [#allocation2]   ;;  %s42_s1 = sshll.u32 %s567_s2, 4  ;;  %s43_s1 = int_to_ptr.hbm [resolvable:$true] %s42_s1 }
   0x7   :  { %s17_s23 = sshll.u32 %s509_s22, 4  ;;  %s510_s0 = smov [#allocation7]   ;;  %s18_s23 = int_to_ptr.vmem [resolvable:$true] %s17_s23 }
   0x8   :  { %23 = dma.hbm_to_vmem [thread:$0]  %s16_s19, 512, %s18_s23, [#allocation3], %s507_s20, %s507_s20, %s508_s21  }
   0x9   :  { %s44_s26 = sshll.u32 %s510_s0, 4  ;;  %s45_s26 = int_to_ptr.vmem [resolvable:$true] %s44_s26 }
   0xa   :  { %47 = dma.hbm_to_vmem [thread:$0]  %s43_s1, 32, %s45_s26, [#allocation6]  }
   0xb   :  { %500 = dma.done.wait [#allocation3], 512  }
   0xc   :  { %501 = vsyncadd [#allocation3], 4294966784 }
   0xd   :  { %502 = dma.done.wait [#allocation6], 2080  }
   0xe   :  { %503 = vsyncadd [#allocation6], 4294965216  ;;  %v75_v0 = vld [vmem:[#allocation5 + $0x78] sm:$0xff]  ;;  %v74_v1 = vld [vmem:[#allocation5 + $0x70] sm:$0xff]  ;;  %vm178_vm1 = vcmask 130048   ;;  %s511_s2 = smov [#allocation8]  }
   0xf   :  { %82 = vmatpush.msra.mxu0 %v75_v0  ;;  %363 = vmatpush.msra.mxu3 %v75_v0  ;;  %v73_v2 = vld [vmem:[#allocation5 + $0x68] sm:$0xff]  ;;  %v72_v3 = vld [vmem:[#allocation5 + $0x60] sm:$0xff]  ;;  %v71_v4 = vld [vmem:[#allocation5 + $0x58] sm:$0xff]  ;;  %s343_s27 = sshll.u32 %s511_s2, 4  ;;  %s345_s30 = sshll.u32 %s568_s3, 4  ;;  %s344_s27 = int_to_ptr.vmem [resolvable:$true] %s343_s27  ;;  %s346_s30 = int_to_ptr.hbm [resolvable:$true] %s345_s30 }
  0x10   :  { %v70_v5 = vld [vmem:[#allocation5 + $0x50] sm:$0xff]  ;;  %v69_v6 = vld [vmem:[#allocation5 + $0x48] sm:$0xff]  ;;  %v68_v7 = vld [vmem:[#allocation5 + $0x40] sm:$0xff] }
  0x11   :  { %83 = vmatpush.msra.mxu0 %v74_v1  ;;  %364 = vmatpush.msra.mxu3 %v74_v1  ;;  %v67_v8 = vld [vmem:[#allocation5 + $0x38] sm:$0xff]  ;;  %v66_v9 = vld [vmem:[#allocation5 + $0x30] sm:$0xff]  ;;  %v65_v10 = vld [vmem:[#allocation5 + $0x28] sm:$0xff] }
  0x12   :  { %v64_v11 = vld [vmem:[#allocation5 + $0x20] sm:$0xff]  ;;  %v63_v12 = vld [vmem:[#allocation5 + $0x18] sm:$0xff]  ;;  %v62_v13 = vld [vmem:[#allocation5 + $0x10] sm:$0xff] }
  0x13   :  { %84 = vmatpush.msra.mxu0 %v73_v2  ;;  %365 = vmatpush.msra.mxu3 %v73_v2  ;;  %v61_v14 = vld [vmem:[#allocation5 + $0x8] sm:$0xff]  ;;  %v60_v15 = vld [vmem:[#allocation5] sm:$0xff]  ;;  %v80_v18 = vld [vmem:[#allocation2 + $0x10] sm:$0xff] }
  0x14   :  { %v78_v16 = vld [vmem:[#allocation2] sm:$0xff]  ;;  %v79_v17 = vld [vmem:[#allocation2 + $0x8] sm:$0xff]  ;;  %v81_v19 = vld [vmem:[#allocation2 + $0x18] sm:$0xff] }
  0x15   :  { %85 = vmatpush.msra.mxu0 %v72_v3  ;;  %366 = vmatpush.msra.mxu3 %v72_v3  ;;  %v386_v20 = vld [vmem:[#allocation7 + $0x1] ss:$0 sm:$0xff]  ;;  %v387_v21 = vld [vmem:[#allocation7] ss:$0 sm:$0xff] }
  0x17   :  { %86 = vmatpush.msra.mxu0 %v71_v4  ;;  %367 = vmatpush.msra.mxu3 %v71_v4 }
  0x19   :  { %87 = vmatpush.msra.mxu0 %v70_v5  ;;  %368 = vmatpush.msra.mxu3 %v70_v5 }
  0x1b   :  { %88 = vmatpush.msra.mxu0 %v69_v6  ;;  %369 = vmatpush.msra.mxu3 %v69_v6 }
  0x1d   :  { %89 = vmatpush.msra.mxu0 %v68_v7  ;;  %370 = vmatpush.msra.mxu3 %v68_v7 }
  0x1f   :  { %90 = vmatpush.msra.mxu0 %v67_v8  ;;  %371 = vmatpush.msra.mxu3 %v67_v8 }
  0x21   :  { %91 = vmatpush.msra.mxu0 %v66_v9  ;;  %372 = vmatpush.msra.mxu3 %v66_v9 }
  0x23   :  { %92 = vmatpush.msra.mxu0 %v65_v10  ;;  %373 = vmatpush.msra.mxu3 %v65_v10 }
  0x25   :  { %93 = vmatpush.msra.mxu0 %v64_v11  ;;  %374 = vmatpush.msra.mxu3 %v64_v11 }
  0x27   :  { %94 = vmatpush.msra.mxu0 %v63_v12  ;;  %375 = vmatpush.msra.mxu3 %v63_v12 }
  0x29   :  { %95 = vmatpush.msra.mxu0 %v62_v13  ;;  %376 = vmatpush.msra.mxu3 %v62_v13 }
  0x2b   :  { %96 = vmatpush.msra.mxu0 %v61_v14  ;;  %377 = vmatpush.msra.mxu3 %v61_v14 }
  0x2d   :  { %97 = vmatpush.msra.mxu0 %v60_v15  ;;  %378 = vmatpush.msra.mxu3 %v60_v15 }
  0x2e   :  { %98 = vmatmul.f32.vlgmr.msra.gmra.mxu0 %v78_v16  ;;  %101 = vmatmul.f32.vlgmr.msra.gmra.mxu3 %v79_v17 }
  0x36   :  { %104 = vmatmul.f32.gmra.mxu3 %v80_v18 }
  0x3e   :  { %107 = vmatmul.f32.gmra.mxu3 %v81_v19 }
  0xab   :  { %v99_v22 = vpop.f32.mrf.mxu0 }
  0xac   :  { %v125_v23 = vmul.f32 %v386_v20, %v99_v22  ;;  %v112_v24 = vmul.f32 %v387_v21, %v99_v22 }
  0xae   :  { %129 = vadd.xlane.f32.xlu1 %v125_v23  ;;  %116 = vadd.xlane.f32.xlu2 %v112_v24 }
  0xb1   :  { %v102_v25 = vpop.f32.mrf.mxu3 }
  0xb2   :  { %227 = vmatpush.msra.mxu1 %v102_v25  ;;  %v126_v26 = vmul.f32 %v386_v20, %v102_v25  ;;  %v113_v30 = vmul.f32 %v387_v21, %v102_v25 }
  0xb4   :  { %228 = vmatpush.msra.mxu1 %v99_v22 }
  0xb6   :  { %131 = vadd.xlane.f32.xlu1 %v126_v26 }
  0xb9   :  { %v105_v27 = vpop.f32.mrf.mxu3 }
  0xba   :  { %v127_v28 = vmul.f32 %v386_v20, %v105_v27  ;;  %v114_v29 = vmul.f32 %v387_v21, %v105_v27 }
  0xbc   :  { %133 = vadd.xlane.f32.xlu0 %v127_v28  ;;  %120 = vadd.xlane.f32.xlu2 %v114_v29 }
  0xbe   :  { %118 = vadd.xlane.f32.xlu1 %v113_v30 }
  0xc1   :  { %v108_v31 = vpop.f32.mrf.mxu3 }
  0xc2   :  { %327 = vmatpush.msra.mxu2 %v108_v31  ;;  %v128_v32 = vmul.f32 %v386_v20, %v108_v31  ;;  %v115_v33 = vmul.f32 %v387_v21, %v108_v31 }
  0xc4   :  { %328 = vmatpush.msra.mxu2 %v105_v27  ;;  %135 = vadd.xlane.f32.xlu0 %v128_v32 }
  0xcc   :  { %122 = vadd.xlane.f32.xlu0 %v115_v33 }
 0x121   :  { %v130_v34 = vpop.xlane.xlu1 %129  ;;  %v117_v38 = vpop.xlane.xlu2 %116 }
 0x122   :  { %137 = vxpose.xlu0.b32.start [1/2] (short) (narrow) %v130_v34, 8 }
 0x129   :  { %v132_v35 = vpop.xlane.xlu1 %131 }
 0x12a   :  { %138 = vxpose.xlu0.b32.end [2/2] (short) (narrow) %v132_v35, 8 }
 0x12f   :  { %v134_v36 = vpop.xlane.xlu0 %133  ;;  %v121_v40 = vpop.xlane.xlu2 %120 }
 0x130   :  { %238 = vxpose.xlu2.b32.start [1/2] (short) (narrow) %v134_v36, 8 }
 0x131   :  { %v119_v55 = vpop.xlane.xlu1 %118 }
 0x137   :  { %v136_v37 = vpop.xlane.xlu0 %135 }
 0x138   :  { %239 = vxpose.xlu2.b32.end [2/2] (short) (narrow) %v136_v37, 8 }
 0x13f   :  { %v123_v39 = vpop.xlane.xlu0 %122 }
 0x1c6   :  { %v153_v41 = vpop.trf.xlu0 }
 0x1c7   :  { %v169_v42 = vperm.slane %v153_v41, 0 }
 0x1c9   :  { %v170_v43 = vadd.f32 %v169_v42, %v117_v38  ;;  %v254_v44 = vpop.trf.xlu2  ;;  %v171_v56 = vadd.f32 %v169_v42, %v119_v55 }
 0x1ca   :  { %v270_v45 = vperm.slane %v254_v44, 0 }
 0x1cb   :  { %vm172_vm0 = vcmp.gt.f32.partialorder %v170_v43, 0.0  ;;  %v174_v46 = vmul.f32 0.01, %v170_v43  ;;  %v175_v59 = vmul.f32 0.01, %v171_v56  ;;  %vm173_vm4 = vcmp.gt.f32.partialorder %v171_v56, 0.0 }
 0x1cc   :  { %v271_v47 = vadd.f32 %v270_v45, %v121_v40  ;;  %v272_v51 = vadd.f32 %v270_v45, %v123_v39 }
 0x1cd   :  { %v176_v48 = vsel %vm172_vm0, %v170_v43, %v174_v46  ;;  %v177_v60 = vsel %vm173_vm4, %v171_v56, %v175_v59 }
 0x1ce   :  { %v179_v49 = vsel %vm178_vm1, %v176_v48, -inf  ;;  %v275_v50 = vmul.f32 0.01, %v271_v47  ;;  %vm273_vm2 = vcmp.gt.f32.partialorder %v271_v47, 0.0  ;;  %v276_v54 = vmul.f32 0.01, %v272_v51 }
 0x1cf   :  { %180 = vmax.xlane.f32.xlu1 %v179_v49  ;;  %vm274_vm3 = vcmp.gt.f32.partialorder %v272_v51, 0.0  ;;  %v182_v61 = vsel %vm178_vm1, %v177_v60, -inf }
 0x1d0   :  { %v277_v52 = vsel %vm273_vm2, %v271_v47, %v275_v50  ;;  %v278_v57 = vsel %vm274_vm3, %v272_v51, %v276_v54 }
 0x1d1   :  { %v279_v53 = vsel %vm178_vm1, %v277_v52, -inf  ;;  %v282_v58 = vsel %vm178_vm1, %v278_v57, -inf }
 0x1d7   :  { %280 = vmax.xlane.f32.xlu1 %v279_v53 }
 0x1df   :  { %283 = vmax.xlane.f32.xlu1 %v282_v58 }
 0x1e7   :  { %183 = vmax.xlane.f32.xlu1 %v182_v61 }
 0x242   :  { %v181_v62 = vpop.xlane.xlu1 %180 }
 0x243   :  { %v185_v1 = vsub.f32 %v176_v48, %v181_v62 }
 0x245   :  { %v187_v3 = vmul.f32 1.442695, %v185_v1 }
 0x24a   :  { %v281_v63 = vpop.xlane.xlu1 %280 }
 0x24b   :  { %v285_v0 = vsub.f32 %v277_v52, %v281_v63 }
 0x24d   :  { %v287_v2 = vmul.f32 1.442695, %v285_v0 }
 0x24f   :  { %388 = vpow2.f32 %v287_v2 }
 0x250   :  { %390 = vpow2.f32 %v187_v3 }
 0x252   :  { %v284_v4 = vpop.xlane.xlu1 %283 }
 0x253   :  { %v286_v5 = vsub.f32 %v278_v57, %v284_v4 }
 0x255   :  { %v389_v6 = vpop.eup %388  ;;  %v289_v7 = vmul.f32 1.442695, %v286_v5 }
 0x256   :  { %v291_v8 = vsel %vm178_vm1, %v389_v6, 0.0  ;;  %v391_v10 = vpop.eup %390 }
 0x257   :  { %392 = vpow2.f32 %v289_v7  ;;  %292 = vadd.xlane.f32.xlu1 %v291_v8  ;;  %v191_v14 = vsel %vm178_vm1, %v391_v10, 0.0 }
 0x25a   :  { %v184_v9 = vpop.xlane.xlu1 %183 }
 0x25b   :  { %v186_v11 = vsub.f32 %v177_v60, %v184_v9 }
 0x25d   :  { %v393_v12 = vpop.eup %392  ;;  %v189_v13 = vmul.f32 1.442695, %v186_v11 }
 0x25e   :  { %v294_v15 = vsel %vm178_vm1, %v393_v12, 0.0 }
 0x25f   :  { %394 = vpow2.f32 %v189_v13  ;;  %192 = vadd.xlane.f32.xlu1 %v191_v14  ;;  %295 = vadd.xlane.f32.xlu2 %v294_v15 }
 0x265   :  { %v395_v16 = vpop.eup %394 }
 0x266   :  { %v194_v17 = vsel %vm178_vm1, %v395_v16, 0.0 }
 0x267   :  { %195 = vadd.xlane.f32.xlu1 %v194_v17 }
 0x2ca   :  { %v293_v18 = vpop.xlane.xlu1 %292 }
 0x2cb   :  { %396 = vrcp.f32 %v293_v18 }
 0x2d1   :  { %v397_v19 = vpop.eup %396 }
 0x2d2   :  { %v299_v20 = vmul.f32 %v397_v19, %v293_v18  ;;  %v296_v21 = vpop.xlane.xlu2 %295  ;;  %v193_v22 = vpop.xlane.xlu1 %192 }
 0x2d3   :  { %398 = vrcp.f32 %v296_v21 }
 0x2d4   :  { %v301_v23 = vsub.f32 2.0, %v299_v20  ;;  %400 = vrcp.f32 %v193_v22 }
 0x2d6   :  { %v303_v24 = vmul.f32 %v397_v19, %v301_v23 }
 0x2d8   :  { %v305_v25 = vmul.f32 %v389_v6, %v303_v24 }
 0x2d9   :  { %v399_v26 = vpop.eup %398 }
 0x2da   :  { %v401_v27 = vpop.eup %400  ;;  %v300_v28 = vmul.f32 %v399_v26, %v296_v21  ;;  %361 = vmatmul.msk.f32.vlgmr.msra.gmra.mxu2 %vm178_vm1, %v305_v25  ;;  %v196_v29 = vpop.xlane.xlu1 %195 }
 0x2db   :  { %v199_v30 = vmul.f32 %v401_v27, %v193_v22  ;;  %402 = vrcp.f32 %v196_v29 }
 0x2dc   :  { %v302_v31 = vsub.f32 2.0, %v300_v28 }
 0x2dd   :  { %v201_v32 = vsub.f32 2.0, %v199_v30 }
 0x2de   :  { %v304_v33 = vmul.f32 %v399_v26, %v302_v31 }
 0x2df   :  { %v203_v34 = vmul.f32 %v401_v27, %v201_v32 }
 0x2e0   :  { %v306_v35 = vmul.f32 %v393_v12, %v304_v33 }
 0x2e1   :  { %v403_v36 = vpop.eup %402  ;;  %v205_v37 = vmul.f32 %v391_v10, %v203_v34 }
 0x2e2   :  { %v200_v38 = vmul.f32 %v403_v36, %v196_v29  ;;  %362 = vmatmul.msk.f32.gmra.mxu2 %vm178_vm1, %v306_v35 }
 0x2e3   :  { %359 = vmatmul.msk.f32.vlgmr.msra.gmra.mxu1 %vm178_vm1, %v205_v37 }
 0x2e4   :  { %v202_v39 = vsub.f32 2.0, %v200_v38 }
 0x2e6   :  { %v204_v40 = vmul.f32 %v403_v36, %v202_v39 }
 0x2e8   :  { %v206_v41 = vmul.f32 %v395_v16, %v204_v40 }
 0x2eb   :  { %360 = vmatmul.msk.f32.gmra.mxu1 %vm178_vm1, %v206_v41 }
 0x35d   :  { %v330_v42 = vpop.f32.mrf.mxu2 }
 0x35e   :  { %337 = vst [vmem:[#allocation8 + $0x10] sm:$0xff] %v330_v42 }
 0x360   :  { %v230_v43 = vpop.f32.mrf.mxu1 }
 0x361   :  { %236 = vst [vmem:[#allocation8] sm:$0xff] %v230_v43 }
 0x365   :  { %v333_v44 = vpop.f32.mrf.mxu2 }
 0x366   :  { %338 = vst [vmem:[#allocation8 + $0x18] sm:$0xff] %v333_v44 }
 0x368   :  { %v233_v45 = vpop.f32.mrf.mxu1 }
 0x369   :  { %237 = vst [vmem:[#allocation8 + $0x8] sm:$0xff] %v233_v45 }
 0x36a   :  { %351 = dma.vmem_to_hbm [thread:$0]  %s344_s27, 512, %s346_s30, [#allocation4], %s507_s20, %s507_s20, %s508_s21  }
 0x36b   :  { %504 = dma.done.wait [#allocation4], 512  }
 0x36c   :  { %505 = vsyncadd [#allocation4], 4294966784 }
 0x36d   :  { %356 = vsyncpa [#allocation3], 1 }
 0x36e   :  { %357 = vsyncpa [#allocation6], 1 }
 0x36f   :  { %358 = vsyncpa [#allocation4], 1 }

</bundles_post_ra>
